<compile_context>
chip_gen: v7x
topology: tpu7x:2x2x1
jax: 0.10.0
libtpu: 0.0.40
codegen_flags: <defaults>
</compile_context>

<pallas_src>
import functools

import jax
import jax.numpy as jnp
from jax.experimental import pallas as pl
from jax.experimental.pallas import tpu as pltpu


# ----------------------------- Pallas kernels -------------------------------

def _attention_pool2_kernel(x_ref, w_ref, o_ref):
    """pool_size == 2 fast path.

    x_ref: (1, 2, d, bt)  de-interleaved window slabs (slot 0 / slot 1)
    w_ref: (d, d)         1x1-conv weight
    o_ref: (1, d, bt)     pooled output
    """
    w = w_ref[...]
    x0 = x_ref[0, 0]                                   # (d, bt)
    x1 = x_ref[0, 1]                                   # (d, bt)

    # 1x1 conv over channels == channel-mixing matmul (MXU), one per slot.
    l0 = jnp.dot(w, x0, preferred_element_type=jnp.float32)
    l1 = jnp.dot(w, x1, preferred_element_type=jnp.float32)

    # Softmax over a 2-wide window == sigmoid of the logit difference.
    # Stable tanh form runs on the otherwise-idle EUP and avoids the
    # max / 2*exp / reciprocal sequence plus its extra live slabs.
    s = 0.5 * (1.0 + jnp.tanh(0.5 * (l1 - l0)))        # attention weight of slot 1
    o_ref[0] = x0 + (x1 - x0) * s


def _attention_pool_kernel(x_ref, w_ref, o_ref, *, pool_size):
    """Generic pool_size path (numerically-stable softmax, fused accumulation).

    x_ref: (1, p, d, bt); w_ref: (d, d); o_ref: (1, d, bt).
    Matmuls are recomputed in the second pass on purpose: the MXU is idle in
    this memory-bound kernel and it keeps at most ~4 (d, bt) slabs live.
    """
    w = w_ref[...]

    mx = jnp.dot(w, x_ref[0, 0], preferred_element_type=jnp.float32)
    for p in range(1, pool_size):
        mx = jnp.maximum(
            mx, jnp.dot(w, x_ref[0, p], preferred_element_type=jnp.float32))

    num = jnp.zeros_like(mx)
    den = jnp.zeros_like(mx)
    for p in range(pool_size):
        xp = x_ref[0, p]
        e = jnp.exp(jnp.dot(w, xp, preferred_element_type=jnp.float32) - mx)
        den = den + e
        num = num + xp * e

    o_ref[0] = num * pl.reciprocal(den)


# ------------------------------- wrapper ------------------------------------

def _round_up(x, mult):
    return -(-x // mult) * mult


def _pick_tile(m, d, b, pool_size):
    """Output-column tile: multiple of 128, sized from a VMEM budget."""
    lane = 128
    # f32, double-buffered: input block (1, p, d, bt) + output block (1, d, bt).
    bytes_per_col = 2 * (pool_size + 1) * d * 4
    vmem_budget = 32 << 20              # safe headroom on v5e/v6e/v7x (64 MiB phys)
    bt_vmem = max(lane, (vmem_budget // bytes_per_col) // lane * lane)
    # Keep the total grid >= ~8 steps (pipeline overlap + both v7x TensorCores).
    steps_per_batch = max(-(-8 // max(b, 1)), 1)
    bt_grid = _round_up(max(-(-m // steps_per_batch), 1), lane)
    return max(lane, min(bt_vmem, bt_grid, 16384))


def attention_pool(x, conv_weight, pool_size=2):
    """AttentionPool forward.

    x:           (b, d, n) float32
    conv_weight: (d, d) or (d, d, 1, 1) — the Conv2d(dim, dim, 1, bias=False) weight.
    returns:     (b, d, n // pool_size + n % pool_size) float32
    """
    b, d, n = x.shape
    w = jnp.asarray(conv_weight).reshape(d, d).astype(jnp.float32)

    remainder = n % pool_size
    if remainder > 0 and pool_size != 2:
        # The PyTorch module's own pad/view arithmetic is only self-consistent
        # for pool_size == 2 (or remainder == 0); mirror that constraint.
        raise NotImplementedError("pool_size > 2 with a length remainder")
    m = n // pool_size + remainder               # matches torch .view(...)

    bt = _pick_tile(m, d, b, pool_size)
    m_pad = _round_up(m, bt)
    n_work = pool_size * m_pad

    x = x.astype(jnp.float32)
    if n_work != n:
        # Positions [n, n+remainder) are the module's own zero pad and DO
        # participate in the softmax (faithful to PyTorch, no masking).
        # Positions >= n+remainder only feed output columns >= m, sliced off below.
        x = jnp.pad(x, ((0, 0), (0, 0), (0, n_work - n)))

    # Single fused XLA relayout pass: de-interleave the pool windows so the
    # kernel sees lane-dense (d, bt) slabs (the pad fuses into this same copy).
    # For enformer-scale d, cast xw/w to bf16 here (keep f32 accumulation) to
    # halve the dominant HBM stream.
    # TODO(synk): fold this pass into the kernel with stride-2 lane loads
    # (ref[..., pl.ds(k, bt, stride=2)]) once strided lane loads are validated.
    xw = x.reshape(b, d, m_pad, pool_size).transpose(0, 3, 1, 2)  # (b, p, d, m_pad)

    grid = (b, m_pad // bt)

    vmem_need = 2 * (pool_size + 1) * d * bt * 4 + 2 * d * d * 4 + (2 << 20)
    bytes_accessed = xw.size * 4 + b * d * m_pad * 4 + d * d * 4
    cost = pl.CostEstimate(
        flops=2 * d * d * pool_size * m_pad * b,
        transcendentals=d * m_pad * b,
        bytes_accessed=bytes_accessed)

    kernel = (_attention_pool2_kernel if pool_size == 2 else
              functools.partial(_attention_pool_kernel, pool_size=pool_size))

    out = pl.pallas_call(
        kernel,
        out_shape=jax.ShapeDtypeStruct((b, d, m_pad), jnp.float32),
        grid=grid,
        in_specs=[
            pl.BlockSpec((1, pool_size, d, bt), lambda bi, i: (bi, 0, 0, i)),
            # Grid-invariant (d, d) weight: same block index every step.
            pl.BlockSpec((d, d), lambda bi, i: (0, 0)),
        ],
        out_specs=pl.BlockSpec((1, d, bt), lambda bi, i: (bi, 0, i)),
        compiler_params=pltpu.CompilerParams(
            dimension_semantics=("parallel", "parallel"),
            vmem_limit_bytes=int(min(max(vmem_need, 8 << 20), 64 << 20))),
        cost_estimate=cost,
    )(xw, w)

    return out if m_pad == m else out[:, :, :m]


# ------------------------------ reference -----------------------------------

def reference_attention_pool(x, conv_weight, pool_size=2):
    """Pure-JAX mirror of the PyTorch forward (eval mode)."""
    b, d, n = x.shape
    w = jnp.asarray(conv_weight).reshape(d, d)
    remainder = n % pool_size
    if remainder > 0:
        x = jnp.pad(x, ((0, 0), (0, 0), (0, remainder)))
    m = n // pool_size + remainder
    xv = x.reshape(b, d, m, pool_size)
    logits = jnp.einsum('oi,bimp->bomp', w, xv,
                        precision=jax.lax.Precision.HIGHEST)
    attn = jax.nn.softmax(logits, axis=-1)
    return (xv * attn).sum(axis=-1)


# ---------------------------------- main -------------------------------------

if __name__ == "__main__":
    b, d, n, pool = 2, 16, 255, 2      # odd n exercises the module's pad quirk; m = 128
    key = jax.random.PRNGKey(0)
    kx, kw = jax.random.split(key)
    x = jax.random.normal(kx, (b, d, n), jnp.float32)

    # Module init: nn.init.dirac_ followed by *2  ->  W = 2*I as a (d, d, 1, 1)
    # conv weight. Add a small perturbation so the channel-mixing matmul path
    # is genuinely exercised (the weight is a learnable parameter).
    w = (2.0 * jnp.eye(d, dtype=jnp.float32)
         + 0.05 * jax.random.normal(kw, (d, d), jnp.float32))
    conv_weight = w.reshape(d, d, 1, 1)

    fn = jax.jit(attention_pool, static_argnames=("pool_size",))
    out = jax.block_until_ready(fn(x, conv_weight, pool_size=pool))
    ref = reference_attention_pool(x, conv_weight, pool)

    assert out.shape == (b, d, n // pool + n % pool), out.shape
    err = float(jnp.max(jnp.abs(out - ref)))
    assert err < 1e-4, err
    print("KERNEL_OK")
</pallas_src>

<mosaic_0001>
module attributes {stable_mosaic.version = 11 : i64} {
  func.func @_attention_pool2_kernel(%arg0: i32, %arg1: i32, %arg2: memref<1x2x16x128xf32, #tpu.memory_space<vmem>>, %arg3: memref<16x16xf32, #tpu.memory_space<vmem>>, %arg4: memref<1x16x128xf32, #tpu.memory_space<vmem>>) attributes {dimension_semantics = [#tpu.dimension_semantics<parallel>, #tpu.dimension_semantics<parallel>], iteration_bounds = array<i64: 2, 1>, scalar_prefetch = 0 : i64, scratch_operands = 0 : i64, tpu.core_type = #tpu.core_type<tc>, window_params = [{transform_indices = @transform_0, window_bounds = array<i64: 1, 2, 16, 128>}, {pipeline_mode = #tpu.pipeline_mode<synchronous>, transform_indices = @transform_1, window_bounds = array<i64: 16, 16>}, {transform_indices = @transform_2, window_bounds = array<i64: 1, 16, 128>}]} {
    %c0 = arith.constant 0 : index
    %c0_0 = arith.constant 0 : index
    %0 = vector.load %arg3[%c0, %c0_0] : memref<16x16xf32, #tpu.memory_space<vmem>>, vector<16x16xf32>
    %c0_1 = arith.constant 0 : index
    %c0_2 = arith.constant 0 : index
    %c0_3 = arith.constant 0 : index
    %c0_4 = arith.constant 0 : index
    %1 = vector.load %arg2[%c0_1, %c0_2, %c0_3, %c0_4] : memref<1x2x16x128xf32, #tpu.memory_space<vmem>>, vector<1x1x16x128xf32>
    %2 = vector.shape_cast %1 : vector<1x1x16x128xf32> to vector<16x128xf32>
    %c0_5 = arith.constant 0 : index
    %c1 = arith.constant 1 : index
    %c0_6 = arith.constant 0 : index
    %c0_7 = arith.constant 0 : index
    %3 = vector.load %arg2[%c0_5, %c1, %c0_6, %c0_7] : memref<1x2x16x128xf32, #tpu.memory_space<vmem>>, vector<1x1x16x128xf32>
    %4 = vector.shape_cast %3 : vector<1x1x16x128xf32> to vector<16x128xf32>
    %cst = arith.constant dense<0.000000e+00> : vector<16x128xf32>
    %5 = tpu.matmul %0, %2, %cst {dimension_numbers = #tpu.dot_dimension_numbers<[1], [0], [0], [1], [0, 0, 1, 1], [], []>} : vector<16x16xf32>, vector<16x128xf32>, vector<16x128xf32> -> vector<16x128xf32>
    %cst_8 = arith.constant dense<0.000000e+00> : vector<16x128xf32>
    %6 = tpu.matmul %0, %4, %cst_8 {dimension_numbers = #tpu.dot_dimension_numbers<[1], [0], [0], [1], [0, 0, 1, 1], [], []>} : vector<16x16xf32>, vector<16x128xf32>, vector<16x128xf32> -> vector<16x128xf32>
    %7 = arith.subf %6, %5 : vector<16x128xf32>
    %cst_9 = arith.constant 5.000000e-01 : f32
    %8 = vector.broadcast %cst_9 : f32 to vector<16x128xf32>
    %9 = arith.mulf %8, %7 : vector<16x128xf32>
    %10 = math.tanh %9 : vector<16x128xf32>
    %cst_10 = arith.constant 1.000000e+00 : f32
    %11 = vector.broadcast %cst_10 : f32 to vector<16x128xf32>
    %12 = arith.addf %11, %10 : vector<16x128xf32>
    %cst_11 = arith.constant 5.000000e-01 : f32
    %13 = vector.broadcast %cst_11 : f32 to vector<16x128xf32>
    %14 = arith.mulf %13, %12 : vector<16x128xf32>
    %15 = arith.subf %4, %2 : vector<16x128xf32>
    %16 = arith.mulf %15, %14 : vector<16x128xf32>
    %17 = arith.addf %2, %16 : vector<16x128xf32>
    %c0_12 = arith.constant 0 : index
    %c0_13 = arith.constant 0 : index
    %c0_14 = arith.constant 0 : index
    %18 = vector.load %arg4[%c0_12, %c0_13, %c0_14] : memref<1x16x128xf32, #tpu.memory_space<vmem>>, vector<1x16x128xf32>
    %19 = vector.shape_cast %18 : vector<1x16x128xf32> to vector<16x128xf32>
    %20 = vector.shape_cast %17 : vector<16x128xf32> to vector<1x16x128xf32>
    tpu.vector_store %arg4[%c0_12, %c0_13, %c0_14], %20 {strides = array<i32>} : memref<1x16x128xf32, #tpu.memory_space<vmem>>, vector<1x16x128xf32>,
    return
  }
  func.func @transform_0(%arg0: i32, %arg1: i32) -> (i32, i32, i32, i32) {
    %c0_i32 = arith.constant 0 : i32
    %c0_i32_0 = arith.constant 0 : i32
    %c0_i32_1 = arith.constant 0 : i32
    return %arg0, %c0_i32, %c0_i32_0, %arg1 : i32, i32, i32, i32
  }
  func.func @transform_1(%arg0: i32, %arg1: i32) -> (i32, i32) {
    %c0_i32 = arith.constant 0 : i32
    %c0_i32_0 = arith.constant 0 : i32
    %c0_i32_1 = arith.constant 0 : i32
    return %c0_i32, %c0_i32_0 : i32, i32
  }
  func.func @transform_2(%arg0: i32, %arg1: i32) -> (i32, i32, i32) {
    %c0_i32 = arith.constant 0 : i32
    %c0_i32_0 = arith.constant 0 : i32
    return %arg0, %c0_i32, %arg1 : i32, i32, i32
  }
}

</mosaic_0001>

<bundles_post_ra>
// kernel: attention_pool.1
= control target key start
LH: loop header
LB: loop body
LE: loop exit
PB: predicated region body
PF: predicated region fallthrough
CT: control target
= control target key end

     0   :  { %7 = vsyncpa [#allocation3], 0  ;;  %s777_s0 = inlined_call_operand.vmem [shape: f32[2,2,16,128], index: 0, kind: input, shape index: {}]   ;;  %s778_s1 = inlined_call_operand.vmem [shape: f32[16,16], index: 1, kind: input, shape index: {}]   ;;  %s779_s2 = inlined_call_operand.hbm [shape: f32[2,16,128], index: 2, kind: output, shape index: {}]  }
   0x1   :  { %9 = vsyncpa [#allocation3 + $0x1], 0  ;;  %s652_s9 = smov 0   ;;  %s654_s10 = smov 0  }
   0x2   :  { %s656_s11 = smov 0   ;;  %s658_s12 = smov 0  }
   0x3   :  { %s660_s13 = smov 0   ;;  %s662_s14 = smov 0  }
   0x4 LB: > { %s442_s15 = sadd.s32 4294967295, %s632_s14   ;;  %s443_s16 = sadd.s32 4294967294, %s632_s14   ;;  %s632_s14 = sphi %s662_s14, %s15_s14   ;;  %s628_s13 = sphi %s660_s13, %s786_s13   ;;  %s624_s12 = sphi %s658_s12, %s785_s12   ;;  %s620_s11 = sphi %s656_s11, %s784_s11   ;;  %s616_s10 = sphi %s654_s10, %s783_s10   ;;  %s612_s9 = sphi %s652_s9, %s782_s9  }
   0x5   : > { %s27_s17 = sadd.s32 1, %s628_s13  ;;  %s85_s18 = sadd.s32 1, %s620_s11 }
   0x6   : > { %p29_p0 = scmp.ge.s32.totalorder %s27_s17, 2  ;;  %p95_p1 = scmp.ne.s32.totalorder %s620_s11, %s616_s10 }
   0x7   : > { %p96_p2 = scmp.eq.s32.totalorder %s442_s15, 1  ;;  %p101_p3 = scmp.ne.s32.totalorder %s616_s10, %s612_s9 }
   0x8   : > { %s788_s17 = smov (%p29_p0, %s27_s17), 0  ;;  %p102_p5 = scmp.eq.s32.totalorder %s443_s16, 1 }
   0x9   : > { %p692_p4 = por %p96_p2, %p95_p1  ;;  %s80_s20 = ssub.s32 %s628_s13, %s788_s17 }
   0xa   : > { %p446_p6 = scmp.ge.s32.totalorder %s632_s14, 1  ;;  %p83_p7 = scmp.eq.s32.totalorder %s80_s20, 0 }
   0xb   : > { %p699_p8 = por %p102_p5, %p101_p3  ;;  %p134_p9 = scmp.lt.s32.totalorder %s632_s14, 3 }
   0xc   : > { %s705_s22 = scalar_select %p83_p7, %s620_s11, %s85_s18  }
   0xd   : > { %p135_p10 = pnand %p446_p6, %p134_p9 }
   0xe   : > { %p159_p11 = scmp.lt.s32.totalorder (!%p135_p10), %s624_s12, 1  ;;  %v167_v0 = vld [vmem:[%s778_s1] sm:$0xff] (!%p135_p10)  ;;  %vm174_vm0 = vcmask (!%p135_p10), 130048   ;;  %v168_v7 = vld [vmem:[%s778_s1 + $0x8] sm:$0xff] (!%p135_p10)  ;;  %s156_s4 = sand.u32 (!%p135_p10), 1, %s616_s10  }
   0xf   : > { %138 = sbr.rel (%p135_p10) target bundleno = 285 (0x11d), region = 28  ;;  %475 = vmatprep.mubr.msk.f32.mxu0 (!%p135_p10), %vm174_vm0, %v167_v0  ;;  %482 = vmatprep.mubr.msk.f32.mxu1 (!%p135_p10), %vm174_vm0, %v167_v0  ;;  %s447_s5 = sshll.u32 (!%p135_p10), %s156_s4, 4 }
  0x10   : > { %s462_s6 = sshll.u32 (!%p135_p10), %s624_s12, 8  ;;  %s158_s7 = scalar_lea.vmem (!%p135_p10), [#allocation2], %s447_s5 }
  0x11   : > { %s364_s8 = sshll.u32 (!%p135_p10), %s158_s7, 4  ;;  %s727_s18 = scalar_lea.hbm (!%p135_p10), %s779_s2, %s462_s6  ;;  %s729_s8 = int_to_ptr.vmem [resolvable:$true] %s364_s8 }
  0x12   : > { %s731_s20 = scalar_lea.sflag (!%p135_p10), [#allocation3], %s156_s4  ;;  %s634_s23 = smov (!%p135_p10), [#allocation2]  }
  0x13   : > { %s558_s24 = sshll.u32 (!%p135_p10), %s634_s23, 4  ;;  %s559_s24 = int_to_ptr.vmem [resolvable:$false] %s558_s24 }
  0x14   : > { %p561_p1 = scmp.lt.s32.totalorder (!%p135_p10), %s729_s8, %s559_s24 }
  0x16   : > { %s160_s25 = scalar_select %p159_p11, %s624_s12, 1 }
  0x17   : > { %s554_s12 = scalar_lea.vmem %s729_s8, 256 }
  0x18   : > { %s461_s26 = sshll.u32 %s160_s25, 5  ;;  %p555_p12 = scmp.ne.s32.totalorder %s729_s8, %s554_s12 }
  0x19   : > { %s166_s29 = scalar_lea.vmem %s777_s0, %s461_s26  ;;  %s560_s25 = scalar_lea.vmem %s559_s24, 512 }
  0x1a   : > { %v169_v1 = vld [vmem:[%s166_s29] sm:$0xff]  ;;  %v170_v2 = vld [vmem:[%s166_s29 + $0x8] sm:$0xff]  ;;  %v450_v3 = vld [vmem:[%s166_s29 + $0x10] sm:$0xff]  ;;  %p556_p13 = pnand %p555_p12, %p692_p4  ;;  %p562_p2 = scmp.lt.s32.totalorder %s560_s25, %s554_s12 }
  0x1b   : > { %v485_v4 = vpack.c.bf16 %v170_v2, %v169_v1  ;;  %v451_v5 = vld [vmem:[%s166_s29 + $0x18] sm:$0xff]  ;;  %v341_v20 = vsub.f32 %v450_v3, %v169_v1 }
  0x1c   : > { %v489_v6 = vpack.c.bf16 %v451_v5, %v450_v3  ;;  %v342_v18 = vsub.f32 %v451_v5, %v170_v2  ;;  %p557_p0 = pneg %p556_p13  ;;  %p563_p3 = por %p562_p2, %p561_p1 }
  0x1d   : > { %486 = vmatprep.subr.bf16.mxu0 %v485_v4 }
  0x1e   : > { %490 = vmatprep.subr.bf16.mxu1 %v489_v6  ;;  %488 = vmatpush3.bf16.msra.mxu0 %v485_v4  ;;  %p564_p5 = pnand %p563_p3, %p557_p0 }
  0x1f   : > { %492 = vmatpush3.bf16.msra.mxu1 %v489_v6 }
  0x21   : > { %476 = vmatmul.mubr.msk.f32.vlgmr.msra.gmra.mrb[0].mxu0 %vm174_vm0, %v168_v7 }
  0x22   : > { %483 = vmatmul.mubr.msk.f32.vlgmr.msra.gmra.mrb[0].mxu1 %vm174_vm0, %v168_v7 }
  0xf4   : > { %v477_v8 = vpop.f32.mrb[0].mxu0 }
  0xf5   : > { %v484_v9 = vpop.f32.mrb[0].mxu1  ;;  %v247_v10 = vpop.f32.mrb[1].mxu0 }
  0xf6   : > { %v332_v11 = vsub.f32 %v484_v9, %v477_v8  ;;  %v322_v12 = vpop.f32.mrb[1].mxu1 }
  0xf7   : > { %v331_v13 = vsub.f32 %v322_v12, %v247_v10 }
  0xf8   : > { %v334_v14 = vmul.f32 0.5, %v332_v11 }
  0xf9   : > { %v333_v15 = vmul.f32 0.5, %v331_v13 }
  0xfa   : > { %550 = vtanh.f32 %v334_v14 }
  0xfb   : > { %552 = vtanh.f32 %v333_v15 }
 0x104   : > { %v551_v16 = vpop.eup %550 }
 0x105   : > { %v553_v17 = vpop.eup %552  ;;  %v338_v19 = vadd.f32 1.0, %v551_v16 }
 0x106   : > { %v337_v21 = vadd.f32 1.0, %v553_v17 }
 0x107   : > { %v340_v22 = vmul.f32 0.5, %v338_v19 }
 0x108   : > { %v339_v23 = vmul.f32 0.5, %v337_v21 }
 0x109   : > { %v344_v24 = vmul.f32 %v342_v18, %v340_v22 }
 0x10a   : > { %v343_v25 = vmul.f32 %v341_v20, %v339_v23 }
 0x10b   : > { %v346_v26 = vadd.f32 %v344_v24, %v170_v2 }
 0x10c   : > { %v345_v27 = vadd.f32 %v343_v25, %v169_v1 }
 0x10d   : > { %348 = vst [vmem:[%s158_s7 + $0x8] sm:$0xff] %v346_v26 }
 0x10e   : > { %347 = vst [vmem:[%s158_s7] sm:$0xff] %v345_v27 }
 0x10f   : > { %567 = shalt.err (!%p564_p5)
}
 0x110   : > { %s568_s26 = scalar_lea.hbm %s727_s18, 256  ;;  %s572_s29 = scalar_lea.hbm %s779_s2, 512 }
 0x111   : > { %p569_p6 = scmp.ne.s32.totalorder %s727_s18, %s568_s26  ;;  %p573_p10 = scmp.lt.u32.totalorder %s727_s18, %s779_s2 }
 0x112   : > { %p574_p11 = scmp.lt.u32.totalorder %s572_s29, %s568_s26  ;;  %p576_p13 = scmp.lt.u32.totalorder %s568_s26, %s727_s18 }
 0x113   : > { %p570_p7 = pnand %p569_p6, %p692_p4 }
 0x114   : > { %p575_p12 = por %p574_p11, %p573_p10 }
 0x115   : > { %p571_p9 = pneg %p570_p7 }
 0x116   : > { %p577_p0 = por %p576_p13, %p575_p12 }
 0x118   : > { %p578_p1 = pnand %p577_p0, %p571_p9 }
 0x11a   : > { %581 = shalt.err (!%p578_p1)
}
 0x11b   : > { %s635_s4 = smov 128   ;;  %s636_s5 = smov 8  }
 0x11c   : > { %493 = dma.vmem_to_hbm [thread:$0]  (%p692_p4), %s729_s8, 256, %s727_s18, %s731_s20, %s635_s4, %s635_s4, %s636_s5  }
 0x11d PF: > { %p499_p2 = scmp.ge.s32.totalorder %s632_s14, 2  ;;  %s379_s6 = sand.u32 1, %s612_s9  }
 0x11e   : > { %s380_s7 = scalar_lea.sflag [#allocation3], %s379_s6 }
 0x11f   : > { %p496_p3 = pnand %p499_p2, %p699_p8 }
 0x121   : > { %607 = dma.done.wait (!%p496_p3), %s380_s7, 256  }
 0x122   : > { %609 = vsyncadd (!%p496_p3), %s380_s7, 4294967040  ;;  %s15_s14 = sadd.s32 1, %s632_s14   ;;  %s782_s9 = smov %s616_s10 }
 0x123   : > { %p12_p5 = scmp.ge.s32.totalorder %s15_s14, 4   ;;  %s783_s10 = smov %s620_s11 }
 0x124   : > { %s784_s11 = smov %s705_s22  ;;  %s785_s12 = smov %s628_s13 }
 0x125   : > { %s786_s13 = smov %s788_s17  ;;  %14 = sbr.rel (!%p12_p5) target bundleno = 4 (0x4), region = 64 }
 0x12c   :  { %385 = vsyncpa [#allocation3], 1 }
 0x12d   :  { %387 = vsyncpa [#allocation3 + $0x1], 1 }

</bundles_post_ra>
